<compile_context>
chip_gen: v5e
topology: v5e:2x2
jax: 0.10.0
libtpu: 0.0.40
codegen_flags: <defaults>
</compile_context>

<pallas_src>
import jax
import jax.numpy as jnp
from jax.experimental import pallas as pl
from jax.experimental.pallas import tpu as pltpu

IN_DIM = 784


def _round_up(n, m):
    return ((n + m - 1) // m) * m


def simplenet_kernel(x_ref, w1_ref, b1_ref, w2_ref, b2_ref, w3_ref, b3_ref,
                     o_ref):
    # Cast the streamed x tile to bf16 in-register; all three matmuls run on
    # the MXU in bf16 with fp32 accumulation; biases are added in fp32.
    x = x_ref[...].astype(jnp.bfloat16)
    h1 = jnp.dot(x, w1_ref[...],
                 preferred_element_type=jnp.float32) + b1_ref[...]
    h2 = jnp.dot(h1.astype(jnp.bfloat16), w2_ref[...],
                 preferred_element_type=jnp.float32) + b2_ref[...]
    h3 = jnp.dot(h2.astype(jnp.bfloat16), w3_ref[...],
                 preferred_element_type=jnp.float32) + b3_ref[...]
    o_ref[...] = h3.astype(o_ref.dtype)


def simplenet_forward(x, params, tile_b=1024):
    """x: any shape that flattens to (-1, 784). Returns (B, out_dim) fp32."""
    w1, b1, w2, b2, w3, b3 = params
    out_dim = w3.shape[1]
    out_pad = _round_up(out_dim, 128)    # lane-dense output (unmasked vst)

    # --- params: bf16 weights (MXU), fp32 biases; w3/b3 zero-padded on N.
    # Tiny (<0.6 MiB total); DMA'd once and VMEM-resident across batch tiles.
    w1p = w1.astype(jnp.bfloat16)
    w2p = w2.astype(jnp.bfloat16)
    w3p = jnp.pad(w3, ((0, 0), (0, out_pad - out_dim))).astype(jnp.bfloat16)
    b1p = b1.astype(jnp.float32)
    b2p = b2.astype(jnp.float32)
    b3p = jnp.pad(b3, ((0, 0), (0, out_pad - out_dim))).astype(jnp.float32)

    # --- x: stream as-is (fp32 or bf16), K stays 784 (full-dim block); no
    # wrapper-side pad/cast pass over the big activation tensor.
    x2d = x.reshape(-1, IN_DIM)
    if x2d.dtype not in (jnp.float32, jnp.bfloat16):
        x2d = x2d.astype(jnp.float32)
    B = x2d.shape[0]

    # --- adaptive batch tiling (cdiv-style): pick tile count first so row
    # padding stays small; force >=2 steps for large single-tile batches so
    # v7x's second TensorCore gets work via the "parallel" axis.
    n = pl.cdiv(B, tile_b)
    if n == 1 and B >= 512:
        n = 2
    sub = 16 if B >= 16 else 8           # 16-sublane tiles once batch allows
    tb = max(8, _round_up(pl.cdiv(B, n), sub))
    Bp = n * tb
    if Bp != B:                          # only pad rows when misaligned
        x2d = jnp.pad(x2d, ((0, Bp - B), (0, 0)))

    # Weights/biases: constant index_map -> same block every step, DMA'd once.
    param_spec = lambda a: pl.BlockSpec(a.shape, lambda i: (0, 0))

    out = pl.pallas_call(
        simplenet_kernel,
        out_shape=jax.ShapeDtypeStruct((Bp, out_pad), jnp.float32),
        grid=(n,),
        in_specs=[pl.BlockSpec((tb, IN_DIM), lambda i: (i, 0)),  # x: streamed
                  param_spec(w1p), param_spec(b1p),
                  param_spec(w2p), param_spec(b2p),
                  param_spec(w3p), param_spec(b3p)],
        out_specs=pl.BlockSpec((tb, out_pad), lambda i: (i, 0)),
        compiler_params=pltpu.CompilerParams(
            dimension_semantics=("parallel",)),
    )(x2d, w1p, b1p, w2p, b2p, w3p, b3p)

    return out[:B, :out_dim]


def init_params(key, input_dim, hidden1_dim, hidden2_dim, out_dim):
    """Deterministic init mimicking nn.Linear's U(-1/sqrt(fan_in), +1/sqrt(fan_in)).
    Weights stored as (in_dim, out_dim); biases as (1, out_dim), all fp32."""
    keys = jax.random.split(key, 6)

    def lin(kw, kb, fan_in, fan_out):
        bound = 1.0 / jnp.sqrt(jnp.float32(fan_in))
        w = jax.random.uniform(kw, (fan_in, fan_out), jnp.float32,
                               minval=-bound, maxval=bound)
        b = jax.random.uniform(kb, (1, fan_out), jnp.float32,
                               minval=-bound, maxval=bound)
        return w, b

    w1, b1 = lin(keys[0], keys[1], input_dim, hidden1_dim)
    w2, b2 = lin(keys[2], keys[3], hidden1_dim, hidden2_dim)
    w3, b3 = lin(keys[4], keys[5], hidden2_dim, out_dim)
    return (w1, b1, w2, b2, w3, b3)


def reference_forward(x, params):
    w1, b1, w2, b2, w3, b3 = params
    x2d = x.reshape(-1, IN_DIM).astype(jnp.float32)
    h1 = x2d @ w1 + b1
    h2 = h1 @ w2 + b2
    return h2 @ w3 + b3


if __name__ == "__main__":
    input_dim, hidden1_dim, hidden2_dim, out_dim = 784, 256, 128, 10
    batch = 8

    key = jax.random.PRNGKey(0)
    k_x, k_p = jax.random.split(key)

    # MNIST-like NCHW input (B, 1, 28, 28); forward() flattens to (B, 784).
    x = jax.random.normal(k_x, (batch, 1, 28, 28), jnp.float32)
    params = init_params(k_p, input_dim, hidden1_dim, hidden2_dim, out_dim)

    out = simplenet_forward(x, params)
    out = jax.block_until_ready(out)

    ref = reference_forward(x, params)
    assert out.shape == (batch, out_dim)
    # bf16 matmuls with fp32 accumulation -> looser tolerance vs fp32 reference.
    assert jnp.allclose(out, ref, atol=2e-2, rtol=2e-2), (
        float(jnp.max(jnp.abs(out - ref))))

    print("KERNEL_OK")
</pallas_src>

<mosaic_0001>
module attributes {stable_mosaic.version = 11 : i64} {
  func.func @simplenet_kernel(%arg0: i32, %arg1: memref<8x784xf32, #tpu.memory_space<vmem>>, %arg2: memref<784x256xbf16, #tpu.memory_space<vmem>>, %arg3: memref<1x256xf32, #tpu.memory_space<vmem>>, %arg4: memref<256x128xbf16, #tpu.memory_space<vmem>>, %arg5: memref<1x128xf32, #tpu.memory_space<vmem>>, %arg6: memref<128x128xbf16, #tpu.memory_space<vmem>>, %arg7: memref<1x128xf32, #tpu.memory_space<vmem>>, %arg8: memref<8x128xf32, #tpu.memory_space<vmem>>) attributes {dimension_semantics = [#tpu.dimension_semantics<parallel>], iteration_bounds = array<i64: 1>, scalar_prefetch = 0 : i64, scratch_operands = 0 : i64, tpu.core_type = #tpu.core_type<tc>, window_params = [{transform_indices = @transform_0, window_bounds = array<i64: 8, 784>}, {pipeline_mode = #tpu.pipeline_mode<synchronous>, transform_indices = @transform_1, window_bounds = array<i64: 784, 256>}, {pipeline_mode = #tpu.pipeline_mode<synchronous>, transform_indices = @transform_2, window_bounds = array<i64: 1, 256>}, {pipeline_mode = #tpu.pipeline_mode<synchronous>, transform_indices = @transform_3, window_bounds = array<i64: 256, 128>}, {pipeline_mode = #tpu.pipeline_mode<synchronous>, transform_indices = @transform_4, window_bounds = array<i64: 1, 128>}, {pipeline_mode = #tpu.pipeline_mode<synchronous>, transform_indices = @transform_5, window_bounds = array<i64: 128, 128>}, {pipeline_mode = #tpu.pipeline_mode<synchronous>, transform_indices = @transform_6, window_bounds = array<i64: 1, 128>}, {transform_indices = @transform_7, window_bounds = array<i64: 8, 128>}]} {
    %c0 = arith.constant 0 : index
    %c0_0 = arith.constant 0 : index
    %0 = vector.load %arg1[%c0, %c0_0] : memref<8x784xf32, #tpu.memory_space<vmem>>, vector<8x784xf32>
    %1 = arith.truncf %0 : vector<8x784xf32> to vector<8x784xbf16>
    %c0_1 = arith.constant 0 : index
    %c0_2 = arith.constant 0 : index
    %2 = vector.load %arg2[%c0_1, %c0_2] : memref<784x256xbf16, #tpu.memory_space<vmem>>, vector<784x256xbf16>
    %cst = arith.constant dense<0.000000e+00> : vector<8x256xf32>
    %3 = tpu.matmul %1, %2, %cst {dimension_numbers = #tpu.dot_dimension_numbers<[1], [0], [0], [1], [0, 0, 1, 1], [], []>} : vector<8x784xbf16>, vector<784x256xbf16>, vector<8x256xf32> -> vector<8x256xf32>
    %c0_3 = arith.constant 0 : index
    %c0_4 = arith.constant 0 : index
    %4 = vector.load %arg3[%c0_3, %c0_4] : memref<1x256xf32, #tpu.memory_space<vmem>>, vector<1x256xf32>
    %5 = vector.broadcast %4 : vector<1x256xf32> to vector<8x256xf32>
    %6 = arith.addf %3, %5 : vector<8x256xf32>
    %7 = arith.truncf %6 : vector<8x256xf32> to vector<8x256xbf16>
    %c0_5 = arith.constant 0 : index
    %c0_6 = arith.constant 0 : index
    %8 = vector.load %arg4[%c0_5, %c0_6] : memref<256x128xbf16, #tpu.memory_space<vmem>>, vector<256x128xbf16>
    %cst_7 = arith.constant dense<0.000000e+00> : vector<8x128xf32>
    %9 = tpu.matmul %7, %8, %cst_7 {dimension_numbers = #tpu.dot_dimension_numbers<[1], [0], [0], [1], [0, 0, 1, 1], [], []>} : vector<8x256xbf16>, vector<256x128xbf16>, vector<8x128xf32> -> vector<8x128xf32>
    %c0_8 = arith.constant 0 : index
    %c0_9 = arith.constant 0 : index
    %10 = vector.load %arg5[%c0_8, %c0_9] : memref<1x128xf32, #tpu.memory_space<vmem>>, vector<1x128xf32>
    %11 = vector.broadcast %10 : vector<1x128xf32> to vector<8x128xf32>
    %12 = arith.addf %9, %11 : vector<8x128xf32>
    %13 = arith.truncf %12 : vector<8x128xf32> to vector<8x128xbf16>
    %c0_10 = arith.constant 0 : index
    %c0_11 = arith.constant 0 : index
    %14 = vector.load %arg6[%c0_10, %c0_11] : memref<128x128xbf16, #tpu.memory_space<vmem>>, vector<128x128xbf16>
    %cst_12 = arith.constant dense<0.000000e+00> : vector<8x128xf32>
    %15 = tpu.matmul %13, %14, %cst_12 {dimension_numbers = #tpu.dot_dimension_numbers<[1], [0], [0], [1], [0, 0, 1, 1], [], []>} : vector<8x128xbf16>, vector<128x128xbf16>, vector<8x128xf32> -> vector<8x128xf32>
    %c0_13 = arith.constant 0 : index
    %c0_14 = arith.constant 0 : index
    %16 = vector.load %arg7[%c0_13, %c0_14] : memref<1x128xf32, #tpu.memory_space<vmem>>, vector<1x128xf32>
    %17 = vector.broadcast %16 : vector<1x128xf32> to vector<8x128xf32>
    %18 = arith.addf %15, %17 : vector<8x128xf32>
    %c0_15 = arith.constant 0 : index
    %c0_16 = arith.constant 0 : index
    %19 = vector.load %arg8[%c0_15, %c0_16] : memref<8x128xf32, #tpu.memory_space<vmem>>, vector<8x128xf32>
    tpu.vector_store %arg8[%c0_15, %c0_16], %18 {strides = array<i32>} : memref<8x128xf32, #tpu.memory_space<vmem>>, vector<8x128xf32>,
    return
  }
  func.func @transform_0(%arg0: i32) -> (i32, i32) {
    %c0_i32 = arith.constant 0 : i32
    %c0_i32_0 = arith.constant 0 : i32
    return %arg0, %c0_i32 : i32, i32
  }
  func.func @transform_1(%arg0: i32) -> (i32, i32) {
    %c0_i32 = arith.constant 0 : i32
    %c0_i32_0 = arith.constant 0 : i32
    %c0_i32_1 = arith.constant 0 : i32
    return %c0_i32, %c0_i32_0 : i32, i32
  }
  func.func @transform_2(%arg0: i32) -> (i32, i32) {
    %c0_i32 = arith.constant 0 : i32
    %c0_i32_0 = arith.constant 0 : i32
    %c0_i32_1 = arith.constant 0 : i32
    return %c0_i32, %c0_i32_0 : i32, i32
  }
  func.func @transform_3(%arg0: i32) -> (i32, i32) {
    %c0_i32 = arith.constant 0 : i32
    %c0_i32_0 = arith.constant 0 : i32
    %c0_i32_1 = arith.constant 0 : i32
    return %c0_i32, %c0_i32_0 : i32, i32
  }
  func.func @transform_4(%arg0: i32) -> (i32, i32) {
    %c0_i32 = arith.constant 0 : i32
    %c0_i32_0 = arith.constant 0 : i32
    %c0_i32_1 = arith.constant 0 : i32
    return %c0_i32, %c0_i32_0 : i32, i32
  }
  func.func @transform_5(%arg0: i32) -> (i32, i32) {
    %c0_i32 = arith.constant 0 : i32
    %c0_i32_0 = arith.constant 0 : i32
    %c0_i32_1 = arith.constant 0 : i32
    return %c0_i32, %c0_i32_0 : i32, i32
  }
  func.func @transform_6(%arg0: i32) -> (i32, i32) {
    %c0_i32 = arith.constant 0 : i32
    %c0_i32_0 = arith.constant 0 : i32
    %c0_i32_1 = arith.constant 0 : i32
    return %c0_i32, %c0_i32_0 : i32, i32
  }
  func.func @transform_7(%arg0: i32) -> (i32, i32) {
    %c0_i32 = arith.constant 0 : i32
    %c0_i32_0 = arith.constant 0 : i32
    return %arg0, %c0_i32 : i32, i32
  }
}

</mosaic_0001>

<bundles_post_ra>
// kernel: tpu_custom_call.1
= control target key start
LH: loop header
LB: loop body
LE: loop exit
PB: predicated region body
PF: predicated region fallthrough
CT: control target
= control target key end

     0   :  { %12 = vsyncpa [#allocation3], 0  ;;  %s2038_s0 = inlined_call_operand.hbm [shape: f32[8,784], index: 0, kind: input, shape index: {}]   ;;  %s2039_s1 = inlined_call_operand.hbm [shape: bf16[784,256], index: 1, kind: input, shape index: {}]   ;;  %s2040_s2 = inlined_call_operand.hbm [shape: f32[1,256], index: 2, kind: input, shape index: {}]   ;;  %s2041_s3 = inlined_call_operand.hbm [shape: bf16[256,128], index: 3, kind: input, shape index: {}]   ;;  %s2042_s4 = inlined_call_operand.vmem [shape: f32[1,128], index: 4, kind: input, shape index: {}]   ;;  %s2043_s5 = inlined_call_operand.hbm [shape: bf16[128,128], index: 5, kind: input, shape index: {}]   ;;  %s2044_s6 = inlined_call_operand.vmem [shape: f32[1,128], index: 6, kind: input, shape index: {}]   ;;  %s2045_s7 = inlined_call_operand.hbm [shape: f32[8,128], index: 7, kind: output, shape index: {}]  }
   0x1   :  { %13 = vsyncpa [#allocation6], 0 }
   0x2   :  { %14 = vsyncpa [#allocation9], 0  ;;  %s31_s26 = sshll.u32 %s2039_s1, 4  ;;  %s32_s26 = int_to_ptr.hbm [resolvable:$true] %s31_s26 }
   0x3   :  { %15 = vsyncpa [#allocation4], 0  ;;  %s1934_s27 = smov [#allocation5]   ;;  %s55_s8 = sshll.u32 %s2041_s3, 4  ;;  %s56_s8 = int_to_ptr.hbm [resolvable:$true] %s55_s8 }
   0x4   :  { %s33_s28 = sshll.u32 %s1934_s27, 4  ;;  %s1935_s9 = smov 128   ;;  %s34_s28 = int_to_ptr.vmem [resolvable:$true] %s33_s28 }
   0x5   :  { %s1936_s10 = smov 8   ;;  %s1937_s11 = smov [#allocation8]  }
   0x6   :  { %39 = dma.hbm_to_vmem [thread:$0]  %s32_s26, 12544, %s34_s28, [#allocation6], %s1935_s9, %s1935_s9, %s1936_s10  }
   0x7   :  { %s57_s12 = sshll.u32 %s1937_s11, 4  ;;  %s1938_s13 = smov 64   ;;  %s58_s12 = int_to_ptr.vmem [resolvable:$true] %s57_s12 }
   0x8   :  { %s1939_s14 = smov 4   ;;  %s21_s16 = sshll.u32 %s2038_s0, 4  ;;  %s22_s16 = int_to_ptr.hbm [resolvable:$true] %s21_s16 }
   0x9   :  { %63 = dma.hbm_to_vmem [thread:$0]  %s56_s8, 2048, %s58_s12, [#allocation9], %s1938_s13, %s1938_s13, %s1939_s14  }
   0xa   :  { %s1940_s17 = smov [#allocation2]   ;;  %s45_s20 = sshll.u32 %s2040_s2, 4  ;;  %s46_s20 = int_to_ptr.hbm [resolvable:$true] %s45_s20 }
   0xb   :  { %s23_s18 = sshll.u32 %s1940_s17, 4  ;;  %s1941_s21 = smov [#allocation7]   ;;  %s24_s18 = int_to_ptr.vmem [resolvable:$true] %s23_s18 }
   0xc   :  { %26 = dma.hbm_to_vmem [thread:$0]  %s22_s16, 896, %s24_s18, [#allocation3]  }
   0xd   :  { %s47_s22 = sshll.u32 %s1941_s21, 4  ;;  %s70_s25 = sshll.u32 %s2043_s5, 4  ;;  %s48_s22 = int_to_ptr.vmem [resolvable:$true] %s47_s22  ;;  %s71_s25 = int_to_ptr.hbm [resolvable:$true] %s70_s25 }
   0xe   :  { %50 = dma.hbm_to_vmem [thread:$0]  %s46_s20, 32, %s48_s22, [#allocation6]  }
   0xf   :  { %s1942_s0 = smov [#allocation10]  }
  0x10   :  { %s72_s26 = sshll.u32 %s1942_s0, 4  ;;  %s73_s26 = int_to_ptr.vmem [resolvable:$true] %s72_s26 }
  0x11   :  { %78 = dma.hbm_to_vmem [thread:$0]  %s71_s25, 1024, %s73_s26, [#allocation9], %s1938_s13, %s1938_s13, %s1939_s14  }
  0x12   :  { %1926 = dma.done.wait [#allocation3], 896  }
  0x13   :  { %1927 = vsyncadd [#allocation3], 4294966400 }
  0x14   :  { %1928 = dma.done.wait [#allocation6], 12576  }
  0x15   :  { %1929 = vsyncadd [#allocation6], 4294954720 }
  0x16   :  { %1930 = dma.done.wait [#allocation9], 3072  }
  0x17   :  { %1931 = vsyncadd [#allocation9], 4294964224  ;;  %v1216_v0 = vld [vmem:[#allocation5 + $0x70] sm:$0xf]  ;;  %v1663_v1 = vld [vmem:[#allocation5 + $0x74] sm:$0xf0] }
  0x18   :  { %v1344_v2 = vld [vmem:[#allocation5 + $0x170] sm:$0xf]  ;;  %v1217_v3 = vor.u32 %v1663_v1, %v1216_v0  ;;  %v1695_v4 = vld [vmem:[#allocation5 + $0x174] sm:$0xf0]  ;;  %v1208_v11 = vld [vmem:[#allocation5 + $0x60] sm:$0xf] }
  0x19   :  { %v1408_v5 = vld [vmem:[#allocation5 + $0x1f0] sm:$0xf]  ;;  %v1711_v6 = vld [vmem:[#allocation5 + $0x1f4] sm:$0xf0]  ;;  %v1345_v7 = vor.u32 %v1695_v4, %v1344_v2  ;;  %v1661_v13 = vld [vmem:[#allocation5 + $0x64] sm:$0xf0] }
  0x1a   :  { %v1409_v8 = vor.u32 %v1711_v6, %v1408_v5  ;;  %v1280_v9 = vld [vmem:[#allocation5 + $0xf0] sm:$0xf]  ;;  %v1679_v10 = vld [vmem:[#allocation5 + $0xf4] sm:$0xf0]  ;;  %714 = vmatpush.bf16.msra.mxu0 %v1217_v3  ;;  %v1336_v14 = vld [vmem:[#allocation5 + $0x160] sm:$0xf]  ;;  %v1209_v16 = vor.u32 %v1661_v13, %v1208_v11 }
  0x1b   :  { %v1281_v12 = vor.u32 %v1679_v10, %v1280_v9  ;;  %v1693_v15 = vld [vmem:[#allocation5 + $0x164] sm:$0xf0]  ;;  %740 = vmatpush.bf16.msra.mxu2 %v1345_v7  ;;  %v1400_v18 = vld [vmem:[#allocation5 + $0x1e0] sm:$0xf]  ;;  %v1200_v23 = vld [vmem:[#allocation5 + $0x50] sm:$0xf] }
  0x1c   :  { %753 = vmatpush.bf16.msra.mxu3 %v1409_v8  ;;  %v1337_v17 = vor.u32 %v1693_v15, %v1336_v14  ;;  %v1709_v19 = vld [vmem:[#allocation5 + $0x1e4] sm:$0xf0]  ;;  %v1272_v20 = vld [vmem:[#allocation5 + $0xe0] sm:$0xf]  ;;  %v1659_v24 = vld [vmem:[#allocation5 + $0x54] sm:$0xf0] }
  0x1d   :  { %727 = vmatpush.bf16.msra.mxu1 %v1281_v12  ;;  %v1401_v21 = vor.u32 %v1709_v19, %v1400_v18  ;;  %v1677_v22 = vld [vmem:[#allocation5 + $0xe4] sm:$0xf0]  ;;  %v1328_v26 = vld [vmem:[#allocation5 + $0x150] sm:$0xf]  ;;  %v1691_v27 = vld [vmem:[#allocation5 + $0x154] sm:$0xf0]  ;;  %v1201_v29 = vor.u32 %v1659_v24, %v1200_v23 }
  0x1e   :  { %v1273_v25 = vor.u32 %v1677_v22, %v1272_v20  ;;  %v1392_v28 = vld [vmem:[#allocation5 + $0x1d0] sm:$0xf]  ;;  %715 = vmatpush.bf16.msra.mxu0 %v1209_v16  ;;  %v1707_v30 = vld [vmem:[#allocation5 + $0x1d4] sm:$0xf0]  ;;  %v1329_v33 = vor.u32 %v1691_v27, %v1328_v26  ;;  %v1192_v35 = vld [vmem:[#allocation5 + $0x40] sm:$0xf] }
  0x1f   :  { %v1264_v31 = vld [vmem:[#allocation5 + $0xd0] sm:$0xf]  ;;  %v1675_v32 = vld [vmem:[#allocation5 + $0xd4] sm:$0xf0]  ;;  %741 = vmatpush.bf16.msra.mxu2 %v1337_v17  ;;  %v1393_v34 = vor.u32 %v1707_v30, %v1392_v28  ;;  %v1657_v36 = vld [vmem:[#allocation5 + $0x44] sm:$0xf0] }
  0x20   :  { %754 = vmatpush.bf16.msra.mxu3 %v1401_v21  ;;  %v1320_v37 = vld [vmem:[#allocation5 + $0x140] sm:$0xf]  ;;  %v1265_v38 = vor.u32 %v1675_v32, %v1264_v31  ;;  %v1689_v39 = vld [vmem:[#allocation5 + $0x144] sm:$0xf0]  ;;  %v1193_v44 = vor.u32 %v1657_v36, %v1192_v35  ;;  %v1184_v47 = vld [vmem:[#allocation5 + $0x30] sm:$0xf] }
  0x21   :  { %728 = vmatpush.bf16.msra.mxu1 %v1273_v25  ;;  %v1384_v40 = vld [vmem:[#allocation5 + $0x1c0] sm:$0xf]  ;;  %v1705_v41 = vld [vmem:[#allocation5 + $0x1c4] sm:$0xf0]  ;;  %v1321_v45 = vor.u32 %v1689_v39, %v1320_v37  ;;  %v1655_v48 = vld [vmem:[#allocation5 + $0x34] sm:$0xf0] }
  0x22   :  { %v1256_v42 = vld [vmem:[#allocation5 + $0xc0] sm:$0xf]  ;;  %v1673_v43 = vld [vmem:[#allocation5 + $0xc4] sm:$0xf0]  ;;  %716 = vmatpush.bf16.msra.mxu0 %v1201_v29  ;;  %v1385_v46 = vor.u32 %v1705_v41, %v1384_v40  ;;  %v1312_v49 = vld [vmem:[#allocation5 + $0x130] sm:$0xf]  ;;  %v1185_v56 = vor.u32 %v1655_v48, %v1184_v47 }
  0x23   :  { %742 = vmatpush.bf16.msra.mxu2 %v1329_v33  ;;  %v1257_v50 = vor.u32 %v1673_v43, %v1256_v42  ;;  %v1687_v51 = vld [vmem:[#allocation5 + $0x134] sm:$0xf0]  ;;  %v1376_v52 = vld [vmem:[#allocation5 + $0x1b0] sm:$0xf]  ;;  %v1176_v59 = vld [vmem:[#allocation5 + $0x20] sm:$0xf] }
  0x24   :  { %755 = vmatpush.bf16.msra.mxu3 %v1393_v34  ;;  %v1703_v53 = vld [vmem:[#allocation5 + $0x1b4] sm:$0xf0]  ;;  %v1248_v54 = vld [vmem:[#allocation5 + $0xb0] sm:$0xf]  ;;  %v1313_v57 = vor.u32 %v1687_v51, %v1312_v49  ;;  %v1653_v60 = vld [vmem:[#allocation5 + $0x24] sm:$0xf0] }
  0x25   :  { %729 = vmatpush.bf16.msra.mxu1 %v1265_v38  ;;  %v1671_v55 = vld [vmem:[#allocation5 + $0xb4] sm:$0xf0]  ;;  %v1377_v58 = vor.u32 %v1703_v53, %v1376_v52  ;;  %v1304_v61 = vld [vmem:[#allocation5 + $0x120] sm:$0xf]  ;;  %v1685_v63 = vld [vmem:[#allocation5 + $0x124] sm:$0xf0]  ;;  %v1177_v4 = vor.u32 %v1653_v60, %v1176_v59 }
  0x26   :  { %717 = vmatpush.bf16.msra.mxu0 %v1193_v44  ;;  %v1249_v62 = vor.u32 %v1671_v55, %v1248_v54  ;;  %v1368_v0 = vld [vmem:[#allocation5 + $0x1a0] sm:$0xf]  ;;  %v1701_v1 = vld [vmem:[#allocation5 + $0x1a4] sm:$0xf0]  ;;  %v1305_v5 = vor.u32 %v1685_v63, %v1304_v61  ;;  %v1168_v7 = vld [vmem:[#allocation5 + $0x10] sm:$0xf] }
  0x27   :  { %743 = vmatpush.bf16.msra.mxu2 %v1321_v45  ;;  %v1240_v2 = vld [vmem:[#allocation5 + $0xa0] sm:$0xf]  ;;  %v1669_v3 = vld [vmem:[#allocation5 + $0xa4] sm:$0xf0]  ;;  %v1369_v6 = vor.u32 %v1701_v1, %v1368_v0  ;;  %v1651_v8 = vld [vmem:[#allocation5 + $0x14] sm:$0xf0] }
  0x28   :  { %756 = vmatpush.bf16.msra.mxu3 %v1385_v46  ;;  %v1296_v9 = vld [vmem:[#allocation5 + $0x110] sm:$0xf]  ;;  %v1241_v10 = vor.u32 %v1669_v3, %v1240_v2  ;;  %v1683_v11 = vld [vmem:[#allocation5 + $0x114] sm:$0xf0]  ;;  %v1169_v16 = vor.u32 %v1651_v8, %v1168_v7  ;;  %v1160_v17 = vld [vmem:[#allocation5] sm:$0xf] }
  0x29   :  { %730 = vmatpush.bf16.msra.mxu1 %v1257_v50  ;;  %v1360_v12 = vld [vmem:[#allocation5 + $0x190] sm:$0xf]  ;;  %v1699_v13 = vld [vmem:[#allocation5 + $0x194] sm:$0xf0]  ;;  %v1649_v18 = vld [vmem:[#allocation5 + $0x4] sm:$0xf0]  ;;  %v1297_v20 = vor.u32 %v1683_v11, %v1296_v9 }
  0x2a   :  { %718 = vmatpush.bf16.msra.mxu0 %v1185_v56  ;;  %v1232_v14 = vld [vmem:[#allocation5 + $0x90] sm:$0xf]  ;;  %v1667_v15 = vld [vmem:[#allocation5 + $0x94] sm:$0xf0]  ;;  %v1288_v19 = vld [vmem:[#allocation5 + $0x100] sm:$0xf]  ;;  %v1361_v21 = vor.u32 %v1699_v13, %v1360_v12  ;;  %v1161_v32 = vor.u32 %v1649_v18, %v1160_v17 }
  0x2b   :  { %744 = vmatpush.bf16.msra.mxu2 %v1313_v57  ;;  %v1681_v22 = vld [vmem:[#allocation5 + $0x104] sm:$0xf0]  ;;  %v1352_v23 = vld [vmem:[#allocation5 + $0x180] sm:$0xf]  ;;  %v1233_v25 = vor.u32 %v1667_v15, %v1232_v14  ;;  %v1472_v26 = vld [vmem:[#allocation5 + $0x270] sm:$0xf] }
  0x2c   :  { %757 = vmatpush.bf16.msra.mxu3 %v1377_v58  ;;  %v1697_v24 = vld [vmem:[#allocation5 + $0x184] sm:$0xf0]  ;;  %v1727_v27 = vld [vmem:[#allocation5 + $0x274] sm:$0xf0]  ;;  %v1662_v28 = vld [vmem:[#allocation5 + $0x74] sm:$0xf]  ;;  %v1289_v36 = vor.u32 %v1681_v22, %v1288_v19 }
  0x2d   :  { %731 = vmatpush.bf16.msra.mxu1 %v1249_v62  ;;  %v1218_v29 = vld [vmem:[#allocation5 + $0x78] sm:$0xf0]  ;;  %v1224_v30 = vld [vmem:[#allocation5 + $0x80] sm:$0xf]  ;;  %v1665_v31 = vld [vmem:[#allocation5 + $0x84] sm:$0xf0]  ;;  %v1353_v37 = vor.u32 %v1697_v24, %v1352_v23  ;;  %v1473_v41 = vor.u32 %v1727_v27, %v1472_v26 }
  0x2e   :  { %719 = vmatpush.bf16.msra.mxu0 %v1177_v4  ;;  %v104_v33 = vld [vmem:[#allocation2 + $0x10] sm:$0xff]  ;;  %v1544_v34 = vld [vmem:[#allocation5 + $0x300] sm:$0xf]  ;;  %v1745_v35 = vld [vmem:[#allocation5 + $0x304] sm:$0xf0]  ;;  %v1221_v42 = vor.u32 %v1662_v28, %v1218_v29  ;;  %v1225_v46 = vor.u32 %v1665_v31, %v1224_v30  ;;  %vm710_vm0 = vcmask 130048  }
  0x2f   :  { %745 = vmatpush.bf16.msra.mxu2 %v1305_v5  ;;  %v1536_v38 = vld [vmem:[#allocation5 + $0x2f0] sm:$0xf]  ;;  %v1743_v39 = vld [vmem:[#allocation5 + $0x2f4] sm:$0xf0]  ;;  %v1678_v40 = vld [vmem:[#allocation5 + $0xf4] sm:$0xf]  ;;  %v1545_v47 = vor.u32 %v1745_v35, %v1544_v34  ;;  %v1999_v51 = vpack.c.bf16 %v104_v33, %v104_v33 }
  0x30   :  { %758 = vmatpush.bf16.msra.mxu3 %v1369_v6  ;;  %v1282_v43 = vld [vmem:[#allocation5 + $0xf8] sm:$0xf0]  ;;  %v1464_v44 = vld [vmem:[#allocation5 + $0x260] sm:$0xf]  ;;  %v102_v45 = vld [vmem:[#allocation2] sm:$0xff]  ;;  %v1537_v52 = vor.u32 %v1743_v39, %v1536_v38  ;;  %s1943_s29 = smov [#allocation11]  }
  0x31   :  { %732 = vmatpush.bf16.msra.mxu1 %v1241_v10  ;;  %v1725_v48 = vld [vmem:[#allocation5 + $0x264] sm:$0xf0]  ;;  %v1660_v49 = vld [vmem:[#allocation5 + $0x64] sm:$0xf]  ;;  %v1210_v50 = vld [vmem:[#allocation5 + $0x68] sm:$0xf0]  ;;  %v1285_v55 = vor.u32 %v1678_v40, %v1282_v43  ;;  %v2001_v56 = vpack.c.bf16 %v102_v45, %v102_v45 }
  0x32   :  { %720 = vmatpush.bf16.msra.mxu0 %v1169_v16  ;;  %v105_v53 = vld [vmem:[#allocation2 + $0x18] sm:$0xff]  ;;  %v103_v54 = vld [vmem:[#allocation2 + $0x8] sm:$0xff]  ;;  %v1741_v58 = vld [vmem:[#allocation5 + $0x2e4] sm:$0xf0]  ;;  %v1465_v59 = vor.u32 %v1725_v48, %v1464_v44  ;;  %v1213_v60 = vor.u32 %v1660_v49, %v1210_v50  ;;  %s1144_s30 = sshll.u32 %s1943_s29, 4  ;;  %s1146_s10 = sshll.u32 %s2045_s7, 4  ;;  %s1145_s30 = int_to_ptr.vmem [resolvable:$true] %s1144_s30  ;;  %s1147_s10 = int_to_ptr.hbm [resolvable:$true] %s1146_s10 }
  0x33   :  { %746 = vmatpush.bf16.msra.mxu2 %v1297_v20  ;;  %v1528_v57 = vld [vmem:[#allocation5 + $0x2e0] sm:$0xf]  ;;  %v1676_v61 = vld [vmem:[#allocation5 + $0xe4] sm:$0xf]  ;;  %v1274_v62 = vld [vmem:[#allocation5 + $0xe8] sm:$0xf0]  ;;  %v2003_v0 = vpack.c.bf16 %v105_v53, %v105_v53  ;;  %v2005_v1 = vpack.c.bf16 %v103_v54, %v103_v54 }
  0x34   :  { %759 = vmatpush.bf16.msra.mxu3 %v1361_v21  ;;  %v1456_v63 = vld [vmem:[#allocation5 + $0x250] sm:$0xf]  ;;  %v1723_v2 = vld [vmem:[#allocation5 + $0x254] sm:$0xf0]  ;;  %v1658_v3 = vld [vmem:[#allocation5 + $0x54] sm:$0xf]  ;;  %v1529_v5 = vor.u32 %v1741_v58, %v1528_v57  ;;  %v1277_v6 = vor.u32 %v1676_v61, %v1274_v62 }
  0x35   :  { %733 = vmatpush.bf16.msra.mxu1 %v1233_v25  ;;  %v1202_v4 = vld [vmem:[#allocation5 + $0x58] sm:$0xf0]  ;;  %v1520_v7 = vld [vmem:[#allocation5 + $0x2d0] sm:$0xf]  ;;  %v1739_v8 = vld [vmem:[#allocation5 + $0x2d4] sm:$0xf0]  ;;  %v1457_v9 = vor.u32 %v1723_v2, %v1456_v63 }
  0x36   :  { %721 = vmatpush.bf16.msra.mxu0 %v1161_v32  ;;  %v1205_v10 = vor.u32 %v1658_v3, %v1202_v4  ;;  %v1674_v11 = vld [vmem:[#allocation5 + $0xd4] sm:$0xf]  ;;  %v1266_v12 = vld [vmem:[#allocation5 + $0xd8] sm:$0xf0]  ;;  %v1448_v13 = vld [vmem:[#allocation5 + $0x240] sm:$0xf]  ;;  %v1521_v17 = vor.u32 %v1739_v8, %v1520_v7 }
  0x37   :  { %747 = vmatpush.bf16.msra.mxu2 %v1289_v36  ;;  %v1721_v14 = vld [vmem:[#allocation5 + $0x244] sm:$0xf0]  ;;  %v1656_v15 = vld [vmem:[#allocation5 + $0x44] sm:$0xf]  ;;  %v1194_v16 = vld [vmem:[#allocation5 + $0x48] sm:$0xf0]  ;;  %v1269_v18 = vor.u32 %v1674_v11, %v1266_v12 }
  0x38   :  { %760 = vmatpush.bf16.msra.mxu3 %v1353_v37  ;;  %v1512_v19 = vld [vmem:[#allocation5 + $0x2c0] sm:$0xf]  ;;  %v1737_v20 = vld [vmem:[#allocation5 + $0x2c4] sm:$0xf0]  ;;  %v1449_v21 = vor.u32 %v1721_v14, %v1448_v13  ;;  %v1197_v22 = vor.u32 %v1656_v15, %v1194_v16  ;;  %v1672_v23 = vld [vmem:[#allocation5 + $0xc4] sm:$0xf] }
  0x39   :  { %734 = vmatpush.bf16.msra.mxu1 %v1225_v46  ;;  %722 = vmatmul.bf16.vlgmr.msra.gmra.mxu0 %v2001_v56  ;;  %v1258_v24 = vld [vmem:[#allocation5 + $0xc8] sm:$0xf0]  ;;  %v1440_v25 = vld [vmem:[#allocation5 + $0x230] sm:$0xf]  ;;  %v1719_v26 = vld [vmem:[#allocation5 + $0x234] sm:$0xf0]  ;;  %v1513_v29 = vor.u32 %v1737_v20, %v1512_v19 }
  0x3a   :  { %766 = vmatpush.bf16.msrb.mxu0 %v1473_v41  ;;  %748 = vmatmul.bf16.vlgmr.msra.gmra.mxu2 %v1999_v51  ;;  %v1654_v27 = vld [vmem:[#allocation5 + $0x34] sm:$0xf]  ;;  %v1186_v28 = vld [vmem:[#allocation5 + $0x38] sm:$0xf0]  ;;  %v1261_v30 = vor.u32 %v1672_v23, %v1258_v24  ;;  %v1504_v31 = vld [vmem:[#allocation5 + $0x2b0] sm:$0xf]  ;;  %v1441_v34 = vor.u32 %v1719_v26, %v1440_v25 }
  0x3b   :  { %799 = vmatpush.bf16.msrb.mxu2 %v1545_v47  ;;  %761 = vmatmul.bf16.vlgmr.msra.gmra.mxu3 %v2003_v0  ;;  %v1735_v32 = vld [vmem:[#allocation5 + $0x2b4] sm:$0xf0]  ;;  %v1189_v35 = vor.u32 %v1654_v27, %v1186_v28  ;;  %v1670_v36 = vld [vmem:[#allocation5 + $0xb4] sm:$0xf]  ;;  %v1250_v37 = vld [vmem:[#allocation5 + $0xb8] sm:$0xf0] }
  0x3c   :  { %805 = vmatpush.bf16.msrb.mxu3 %v1221_v42  ;;  %735 = vmatmul.bf16.vlgmr.msra.gmra.mxu1 %v2005_v1  ;;  %v108_v33 = vld [vmem:[#allocation2 + $0x30] sm:$0xff]  ;;  %v1432_v38 = vld [vmem:[#allocation5 + $0x220] sm:$0xf]  ;;  %v1717_v39 = vld [vmem:[#allocation5 + $0x224] sm:$0xf0]  ;;  %v1505_v42 = vor.u32 %v1735_v32, %v1504_v31  ;;  %v1253_v44 = vor.u32 %v1670_v36, %v1250_v37 }
  0x3d   :  { %779 = vmatpush.bf16.msrb.mxu1 %v1537_v52  ;;  %v1652_v40 = vld [vmem:[#allocation5 + $0x24] sm:$0xf]  ;;  %v1178_v41 = vld [vmem:[#allocation5 + $0x28] sm:$0xf0]  ;;  %v2011_v43 = vpack.c.bf16 %v108_v33, %v108_v33  ;;  %v1496_v45 = vld [vmem:[#allocation5 + $0x2a0] sm:$0xf]  ;;  %v1433_v47 = vor.u32 %v1717_v39, %v1432_v38 }
  0x3e   :  { %767 = vmatpush.bf16.msrb.mxu0 %v1465_v59  ;;  %v1733_v46 = vld [vmem:[#allocation5 + $0x2a4] sm:$0xf0]  ;;  %v1181_v48 = vor.u32 %v1652_v40, %v1178_v41  ;;  %v1668_v49 = vld [vmem:[#allocation5 + $0xa4] sm:$0xf]  ;;  %v1242_v50 = vld [vmem:[#allocation5 + $0xa8] sm:$0xf0] }
  0x3f   :  { %818 = vmatpush.bf16.msra.mxu2 %v1285_v55  ;;  %v1424_v52 = vld [vmem:[#allocation5 + $0x210] sm:$0xf]  ;;  %v1715_v53 = vld [vmem:[#allocation5 + $0x214] sm:$0xf0]  ;;  %v1650_v54 = vld [vmem:[#allocation5 + $0x14] sm:$0xf]  ;;  %v1497_v57 = vor.u32 %v1733_v46, %v1496_v45  ;;  %v1245_v58 = vor.u32 %v1668_v49, %v1242_v50 }
  0x40   :  { %806 = vmatpush.bf16.msrb.mxu3 %v1213_v60  ;;  %v1170_v55 = vld [vmem:[#allocation5 + $0x18] sm:$0xf0]  ;;  %v1488_v59 = vld [vmem:[#allocation5 + $0x290] sm:$0xf]  ;;  %v1731_v60 = vld [vmem:[#allocation5 + $0x294] sm:$0xf0]  ;;  %v1425_v62 = vor.u32 %v1715_v53, %v1424_v52 }
  0x41   :  { %780 = vmatpush.bf16.msrb.mxu1 %v1529_v5  ;;  %v1666_v61 = vld [vmem:[#allocation5 + $0x94] sm:$0xf]  ;;  %v1173_v63 = vor.u32 %v1650_v54, %v1170_v55  ;;  %v1234_v2 = vld [vmem:[#allocation5 + $0x98] sm:$0xf0]  ;;  %v1416_v3 = vld [vmem:[#allocation5 + $0x200] sm:$0xf]  ;;  %v1489_v8 = vor.u32 %v1731_v60, %v1488_v59 }
  0x42   :  { %768 = vmatpush.bf16.msrb.mxu0 %v1457_v9  ;;  %v1713_v4 = vld [vmem:[#allocation5 + $0x204] sm:$0xf0]  ;;  %v1648_v5 = vld [vmem:[#allocation5 + $0x4] sm:$0xf]  ;;  %v1694_v7 = vld [vmem:[#allocation5 + $0x174] sm:$0xf]  ;;  %v1237_v12 = vor.u32 %v1666_v61, %v1234_v2 }
  0x43   :  { %819 = vmatpush.bf16.msra.mxu2 %v1277_v6  ;;  %v1162_v6 = vld [vmem:[#allocation5 + $0x8] sm:$0xf0]  ;;  %v1346_v9 = vld [vmem:[#allocation5 + $0x178] sm:$0xf0]  ;;  %v1480_v13 = vld [vmem:[#allocation5 + $0x280] sm:$0xf]  ;;  %v1417_v16 = vor.u32 %v1713_v4, %v1416_v3 }
  0x44   :  { %807 = vmatpush.bf16.msrb.mxu3 %v1205_v10  ;;  %v1726_v10 = vld [vmem:[#allocation5 + $0x274] sm:$0xf]  ;;  %v1474_v11 = vld [vmem:[#allocation5 + $0x278] sm:$0xf0]  ;;  %v1729_v14 = vld [vmem:[#allocation5 + $0x284] sm:$0xf0] }
  0x45   :  { %781 = vmatpush.bf16.msrb.mxu1 %v1521_v17  ;;  %v106_v15 = vld [vmem:[#allocation2 + $0x20] sm:$0xff]  ;;  %v1165_v17 = vor.u32 %v1648_v5, %v1162_v6  ;;  %v1710_v20 = vld [vmem:[#allocation5 + $0x1f4] sm:$0xf]  ;;  %v1410_v23 = vld [vmem:[#allocation5 + $0x1f8] sm:$0xf0]  ;;  %v1481_v26 = vor.u32 %v1729_v14, %v1480_v13 }
  0x46   :  { %769 = vmatpush.bf16.msrb.mxu0 %v1449_v21  ;;  %v1226_v19 = vld [vmem:[#allocation5 + $0x88] sm:$0xf0]  ;;  %v1349_v21 = vor.u32 %v1694_v7, %v1346_v9  ;;  %v1742_v24 = vld [vmem:[#allocation5 + $0x2f4] sm:$0xf]  ;;  %v1538_v25 = vld [vmem:[#allocation5 + $0x2f8] sm:$0xf0] }
  0x47   :  { %820 = vmatpush.bf16.msra.mxu2 %v1269_v18  ;;  %v1664_v18 = vld [vmem:[#allocation5 + $0x84] sm:$0xf]  ;;  %v107_v27 = vld [vmem:[#allocation2 + $0x28] sm:$0xff]  ;;  %v1466_v33 = vld [vmem:[#allocation5 + $0x268] sm:$0xf0] }
  0x48   :  { %808 = vmatpush.bf16.msrb.mxu3 %v1197_v22  ;;  %v1477_v22 = vor.u32 %v1726_v10, %v1474_v11  ;;  %v1692_v28 = vld [vmem:[#allocation5 + $0x164] sm:$0xf]  ;;  %v1229_v31 = vor.u32 %v1664_v18, %v1226_v19  ;;  %v2017_v37 = vpack.c.bf16 %v107_v27, %v107_v27  ;;  %v1402_v39 = vld [vmem:[#allocation5 + $0x1e8] sm:$0xf0]  ;;  %v1330_v45 = vld [vmem:[#allocation5 + $0x158] sm:$0xf0] }
  0x49   :  { %782 = vmatpush.bf16.msrb.mxu1 %v1513_v29  ;;  %v1338_v29 = vld [vmem:[#allocation5 + $0x168] sm:$0xf0]  ;;  %v1724_v32 = vld [vmem:[#allocation5 + $0x264] sm:$0xf]  ;;  %v1722_v46 = vld [vmem:[#allocation5 + $0x254] sm:$0xf] }
  0x4a   :  { %770 = vmatpush.bf16.msrb.mxu0 %v1441_v34  ;;  %1550 = vmatmul.msk.bf16.vlgmr.msrb.gmra.mxu2 %vm710_vm0, %v2011_v43  ;;  %v1413_v34 = vor.u32 %v1710_v20, %v1410_v23  ;;  %v1708_v36 = vld [vmem:[#allocation5 + $0x1e4] sm:$0xf]  ;;  %v1341_v38 = vor.u32 %v1692_v28, %v1338_v29  ;;  %v1530_v41 = vld [vmem:[#allocation5 + $0x2e8] sm:$0xf0]  ;;  %v1706_v50 = vld [vmem:[#allocation5 + $0x1d4] sm:$0xf] }
  0x4b   :  { %821 = vmatpush.bf16.msra.mxu2 %v1261_v30  ;;  %v2015_v30 = vpack.c.bf16 %v106_v15, %v106_v15  ;;  %v1740_v40 = vld [vmem:[#allocation5 + $0x2e4] sm:$0xf]  ;;  %v1394_v53 = vld [vmem:[#allocation5 + $0x1d8] sm:$0xf0]  ;;  %v1738_v54 = vld [vmem:[#allocation5 + $0x2d4] sm:$0xf] }
  0x4c   :  { %809 = vmatpush.bf16.msrb.mxu3 %v1189_v35  ;;  %v1541_v35 = vor.u32 %v1742_v24, %v1538_v25  ;;  %v1533_v49 = vor.u32 %v1740_v40, %v1530_v41  ;;  %v1522_v55 = vld [vmem:[#allocation5 + $0x2d8] sm:$0xf0]  ;;  %v1322_v59 = vld [vmem:[#allocation5 + $0x148] sm:$0xf0]  ;;  %v1720_v60 = vld [vmem:[#allocation5 + $0x244] sm:$0xf] }
  0x4d   :  { %783 = vmatpush.bf16.msrb.mxu1 %v1505_v42  ;;  %v1469_v42 = vor.u32 %v1724_v32, %v1466_v33  ;;  %v1450_v61 = vld [vmem:[#allocation5 + $0x248] sm:$0xf0]  ;;  %v1704_v2 = vld [vmem:[#allocation5 + $0x1c4] sm:$0xf]  ;;  %v1718_v9 = vld [vmem:[#allocation5 + $0x234] sm:$0xf] }
  0x4e   :  { %771 = vmatpush.bf16.msrb.mxu0 %v1433_v47  ;;  %v1458_v47 = vld [vmem:[#allocation5 + $0x258] sm:$0xf0]  ;;  %v1386_v4 = vld [vmem:[#allocation5 + $0x1c8] sm:$0xf0]  ;;  %v1736_v5 = vld [vmem:[#allocation5 + $0x2c4] sm:$0xf]  ;;  %v1453_v7 = vor.u32 %v1720_v60, %v1450_v61 }
  0x4f   :  { %822 = vmatpush.bf16.msra.mxu2 %v1253_v44  ;;  %v1690_v44 = vld [vmem:[#allocation5 + $0x154] sm:$0xf]  ;;  %v1514_v6 = vld [vmem:[#allocation5 + $0x2c8] sm:$0xf0]  ;;  %v1442_v10 = vld [vmem:[#allocation5 + $0x238] sm:$0xf0]  ;;  %v1389_v11 = vor.u32 %v1704_v2, %v1386_v4 }
  0x50   :  { %810 = vmatpush.bf16.msrb.mxu3 %v1181_v48  ;;  %v1405_v48 = vor.u32 %v1708_v36, %v1402_v39  ;;  %v1333_v52 = vor.u32 %v1690_v44, %v1330_v45  ;;  %v1378_v14 = vld [vmem:[#allocation5 + $0x1b8] sm:$0xf0]  ;;  %v1734_v15 = vld [vmem:[#allocation5 + $0x2b4] sm:$0xf]  ;;  %v1684_v18 = vld [vmem:[#allocation5 + $0x124] sm:$0xf] }
  0x51   :  { %784 = vmatpush.bf16.msrb.mxu1 %v1497_v57  ;;  %v1461_v57 = vor.u32 %v1722_v46, %v1458_v47  ;;  %v1306_v19 = vld [vmem:[#allocation5 + $0x128] sm:$0xf0]  ;;  %v1716_v20 = vld [vmem:[#allocation5 + $0x224] sm:$0xf]  ;;  %v1298_v32 = vld [vmem:[#allocation5 + $0x118] sm:$0xf0] }
  0x52   :  { %772 = vmatpush.bf16.msrb.mxu0 %v1425_v62  ;;  %v1397_v62 = vor.u32 %v1706_v50, %v1394_v53  ;;  %v1700_v24 = vld [vmem:[#allocation5 + $0x1a4] sm:$0xf]  ;;  %v1309_v25 = vor.u32 %v1684_v18, %v1306_v19  ;;  %v1498_v28 = vld [vmem:[#allocation5 + $0x2a8] sm:$0xf0]  ;;  %v1714_v33 = vld [vmem:[#allocation5 + $0x214] sm:$0xf] }
  0x53   :  { %823 = vmatpush.bf16.msra.mxu2 %v1245_v58  ;;  %v1688_v58 = vld [vmem:[#allocation5 + $0x144] sm:$0xf]  ;;  %v1362_v40 = vld [vmem:[#allocation5 + $0x198] sm:$0xf0]  ;;  %v1730_v41 = vld [vmem:[#allocation5 + $0x294] sm:$0xf] }
  0x54   :  { %811 = vmatpush.bf16.msrb.mxu3 %v1173_v63  ;;  %v1525_v63 = vor.u32 %v1738_v54, %v1522_v55  ;;  %v1325_v3 = vor.u32 %v1688_v58, %v1322_v59  ;;  %v1732_v27 = vld [vmem:[#allocation5 + $0x2a4] sm:$0xf]  ;;  %v1290_v46 = vld [vmem:[#allocation5 + $0x108] sm:$0xf0]  ;;  %v1751_v4 = vld [vmem:[#allocation8 + $0x28] sm:$0xff] }
  0x55   :  { %785 = vmatpush.bf16.msrb.mxu1 %v1489_v8  ;;  %v1686_v8 = vld [vmem:[#allocation5 + $0x134] sm:$0xf]  ;;  %v1501_v36 = vor.u32 %v1732_v27, %v1498_v28  ;;  %v1680_v45 = vld [vmem:[#allocation5 + $0x104] sm:$0xf]  ;;  %v1354_v54 = vld [vmem:[#allocation5 + $0x188] sm:$0xf0] }
  0x56   :  { %773 = vmatpush.bf16.msrb.mxu0 %v1417_v16  ;;  %v1506_v16 = vld [vmem:[#allocation5 + $0x2b8] sm:$0xf0]  ;;  %v1712_v47 = vld [vmem:[#allocation5 + $0x204] sm:$0xf]  ;;  %v1482_v58 = vld [vmem:[#allocation5 + $0x288] sm:$0xf0] }
  0x57   :  { %824 = vmatpush.bf16.msra.mxu2 %v1237_v12  ;;  %v1702_v12 = vld [vmem:[#allocation5 + $0x1b4] sm:$0xf]  ;;  %v1509_v23 = vor.u32 %v1734_v15, %v1506_v16  ;;  %v1696_v53 = vld [vmem:[#allocation5 + $0x184] sm:$0xf]  ;;  %v1546_v60 = vld [vmem:[#allocation5 + $0x308] sm:$0xf0] }
  0x58   :  { %812 = vmatpush.bf16.msrb.mxu3 %v1165_v17  ;;  %v1445_v17 = vor.u32 %v1718_v9, %v1442_v10  ;;  %v1744_v59 = vld [vmem:[#allocation5 + $0x304] sm:$0xf]  ;;  %v1357_v61 = vor.u32 %v1696_v53, %v1354_v54  ;;  %v1753_v2 = vld [vmem:[#allocation8 + $0x38] sm:$0xff]  ;;  %v1758_v28 = vld [vmem:[#allocation8 + $0x60] sm:$0xff] }
  0x59   :  { %786 = vmatpush.bf16.msrb.mxu1 %v1481_v26  ;;  %774 = vmatmul.bf16.vlgmr.msrb.gmra.mxu0 %v2015_v30  ;;  %v1370_v26 = vld [vmem:[#allocation5 + $0x1a8] sm:$0xf0]  ;;  %v1760_v19 = vld [vmem:[#allocation8 + $0x70] sm:$0xff] }
  0x5a   :  { %831 = vmatpush.bf16.msra.mxu0 %v1349_v21  ;;  %v1434_v21 = vld [vmem:[#allocation5 + $0x228] sm:$0xf0] }
  0x5b   :  { %825 = vmatpush.bf16.msra.mxu2 %v1229_v31  ;;  %813 = vmatmul.bf16.vlgmr.msrb.gmra.mxu3 %v2001_v56  ;;  %v1517_v56 = vor.u32 %v1736_v5, %v1514_v6  ;;  %v1437_v29 = vor.u32 %v1716_v20, %v1434_v21  ;;  %v1682_v31 = vld [vmem:[#allocation5 + $0x114] sm:$0xf]  ;;  %v1747_v6 = vld [vmem:[#allocation8 + $0x8] sm:$0xff] }
  0x5c   :  { %857 = vmatpush.bf16.msra.mxu3 %v1477_v22  ;;  %787 = vmatmul.bf16.vlgmr.msrb.gmra.mxu1 %v2017_v37  ;;  %v1381_v22 = vor.u32 %v1702_v12, %v1378_v14  ;;  %v1301_v39 = vor.u32 %v1682_v31, %v1298_v32  ;;  %v1750_v5 = vld [vmem:[#allocation8 + $0x20] sm:$0xff]  ;;  %v1761_v12 = vld [vmem:[#allocation8 + $0x78] sm:$0xff] }
  0x5d   :  { %844 = vmatpush.bf16.msra.mxu1 %v1413_v34  ;;  %v1426_v34 = vld [vmem:[#allocation5 + $0x218] sm:$0xf0]  ;;  %v1757_v32 = vld [vmem:[#allocation8 + $0x58] sm:$0xff] }
  0x5e   :  { %832 = vmatpush.bf16.msra.mxu0 %v1341_v38  ;;  %826 = vmatmul.bf16.vlgmr.msra.gmra.mxu2 %v2005_v1  ;;  %v1314_v1 = vld [vmem:[#allocation5 + $0x138] sm:$0xf0]  ;;  %v1698_v38 = vld [vmem:[#allocation5 + $0x194] sm:$0xf]  ;;  %v1429_v44 = vor.u32 %v1714_v33, %v1426_v34 }
  0x5f   :  { %870 = vmatpush.bf16.msrb.mxu2 %v1541_v35  ;;  %v1317_v13 = vor.u32 %v1686_v8, %v1314_v1  ;;  %v1373_v35 = vor.u32 %v1700_v24, %v1370_v26 }
  0x60   :  { %858 = vmatpush.bf16.msra.mxu3 %v1469_v42  ;;  %v1490_v42 = vld [vmem:[#allocation5 + $0x298] sm:$0xf0] }
  0x61   :  { %845 = vmatpush.bf16.msra.mxu1 %v1405_v48  ;;  %v1418_v48 = vld [vmem:[#allocation5 + $0x208] sm:$0xf0]  ;;  %v1493_v50 = vor.u32 %v1730_v41, %v1490_v42 }
  0x62   :  { %833 = vmatpush.bf16.msra.mxu0 %v1333_v52  ;;  %v1293_v52 = vor.u32 %v1680_v45, %v1290_v46  ;;  %v1421_v55 = vor.u32 %v1712_v47, %v1418_v48 }
  0x63   :  { %871 = vmatpush.bf16.msrb.mxu2 %v1533_v49  ;;  %v1365_v49 = vor.u32 %v1698_v38, %v1362_v40  ;;  %v1755_v38 = vld [vmem:[#allocation8 + $0x48] sm:$0xff]  ;;  %v1754_v40 = vld [vmem:[#allocation8 + $0x40] sm:$0xff] }
  0x64   :  { %859 = vmatpush.bf16.msra.mxu3 %v1461_v57  ;;  %v1728_v57 = vld [vmem:[#allocation5 + $0x284] sm:$0xf] }
  0x65   :  { %846 = vmatpush.bf16.msra.mxu1 %v1397_v62  ;;  %v1485_v62 = vor.u32 %v1728_v57, %v1482_v58 }
  0x66   :  { %834 = vmatpush.bf16.msra.mxu0 %v1325_v3  ;;  %v1752_v3 = vld [vmem:[#allocation8 + $0x30] sm:$0xff] }
  0x67   :  { %872 = vmatpush.bf16.msrb.mxu2 %v1525_v63  ;;  %v1549_v63 = vor.u32 %v1744_v59, %v1546_v60 }
  0x68   :  { %860 = vmatpush.bf16.msra.mxu3 %v1453_v7  ;;  %v1746_v7 = vld [vmem:[#allocation8] sm:$0xff] }
  0x69   :  { %847 = vmatpush.bf16.msra.mxu1 %v1389_v11 }
  0x6a   :  { %835 = vmatpush.bf16.msra.mxu0 %v1317_v13 }
  0x6b   :  { %873 = vmatpush.bf16.msrb.mxu2 %v1517_v56 }
  0x6c   :  { %861 = vmatpush.bf16.msra.mxu3 %v1445_v17 }
  0x6d   :  { %848 = vmatpush.bf16.msra.mxu1 %v1381_v22 }
  0x6e   :  { %836 = vmatpush.bf16.msra.mxu0 %v1309_v25  ;;  %v1759_v25 = vld [vmem:[#allocation8 + $0x68] sm:$0xff] }
  0x6f   :  { %874 = vmatpush.bf16.msrb.mxu2 %v1509_v23 }
  0x70   :  { %862 = vmatpush.bf16.msra.mxu3 %v1437_v29 }
  0x71   :  { %849 = vmatpush.bf16.msra.mxu1 %v1373_v35  ;;  %v1756_v35 = vld [vmem:[#allocation8 + $0x50] sm:$0xff] }
  0x72   :  { %837 = vmatpush.bf16.msra.mxu0 %v1301_v39 }
  0x73   :  { %875 = vmatpush.bf16.msrb.mxu2 %v1501_v36 }
  0x74   :  { %863 = vmatpush.bf16.msra.mxu3 %v1429_v44 }
  0x75   :  { %850 = vmatpush.bf16.msra.mxu1 %v1365_v49 }
  0x76   :  { %838 = vmatpush.bf16.msra.mxu0 %v1293_v52 }
  0x77   :  { %876 = vmatpush.bf16.msrb.mxu2 %v1493_v50 }
  0x78   :  { %864 = vmatpush.bf16.msra.mxu3 %v1421_v55 }
  0x79   :  { %851 = vmatpush.bf16.msra.mxu1 %v1357_v61  ;;  %839 = vmatmul.bf16.vlgmr.msra.gmra.mxu0 %v1999_v51  ;;  %v1749_v51 = vld [vmem:[#allocation8 + $0x18] sm:$0xff] }
  0x7b   :  { %865 = vmatmul.bf16.vlgmr.msra.gmra.mxu3 %v2015_v30  ;;  %877 = vmatpush.bf16.msrb.mxu2 %v1485_v62  ;;  %v1748_v30 = vld [vmem:[#allocation8 + $0x10] sm:$0xff] }
  0x7c   :  { %852 = vmatmul.bf16.vlgmr.msra.gmra.mxu1 %v2003_v0  ;;  %1043 = vmatpush.bf16.msrb.mxu3 %v1761_v12 }
  0x7d   :  { %1030 = vmatpush.bf16.msrb.mxu1 %v1753_v2  ;;  %v1768_v2 = vld [vmem:[#allocation10 + $0x30] sm:$0xff] }
  0x7e   :  { %878 = vmatmul.bf16.vlgmr.msrb.gmra.mxu2 %v2017_v37 }
  0x7f   :  { %890 = vmatpush.bf16.msra.mxu2 %v1549_v63  ;;  %v1769_v63 = vld [vmem:[#allocation10 + $0x38] sm:$0xff] }
  0x80   :  { %1044 = vmatpush.bf16.msrb.mxu3 %v1760_v19  ;;  %1125 = vmatpush.bf16.msrb.mxu0 %v1769_v63 }
  0x81   :  { %1031 = vmatpush.bf16.msrb.mxu1 %v1752_v3  ;;  %v1767_v3 = vld [vmem:[#allocation10 + $0x28] sm:$0xff] }
  0x84   :  { %1045 = vmatpush.bf16.msrb.mxu3 %v1759_v25  ;;  %1126 = vmatpush.bf16.msrb.mxu0 %v1768_v2 }
  0x85   :  { %1032 = vmatpush.bf16.msrb.mxu1 %v1751_v4  ;;  %v1766_v4 = vld [vmem:[#allocation10 + $0x20] sm:$0xff] }
  0x88   :  { %1046 = vmatpush.bf16.msrb.mxu3 %v1758_v28  ;;  %1127 = vmatpush.bf16.msrb.mxu0 %v1767_v3 }
  0x89   :  { %1033 = vmatpush.bf16.msrb.mxu1 %v1750_v5  ;;  %v1765_v5 = vld [vmem:[#allocation10 + $0x18] sm:$0xff] }
  0x8c   :  { %1047 = vmatpush.bf16.msrb.mxu3 %v1757_v32  ;;  %1128 = vmatpush.bf16.msrb.mxu0 %v1766_v4 }
  0x8d   :  { %1034 = vmatpush.bf16.msrb.mxu1 %v1749_v51  ;;  %v1764_v51 = vld [vmem:[#allocation10 + $0x10] sm:$0xff] }
  0x8e   :  { %1551 = vmatmul.msk.bf16.vlgmr.msra.gmra.mxu2 %vm710_vm0, %v2011_v43  ;;  %v214_v43 = vld [vmem:[#allocation7] sm:$0x3] }
  0x8f   :  { %v216_v11 = vperm.slane %v214_v43, 0  ;;  %v217_v44 = vperm.slane %v214_v43, 1 }
  0x90   :  { %1048 = vmatpush.bf16.msrb.mxu3 %v1756_v35  ;;  %1129 = vmatpush.bf16.msrb.mxu0 %v1765_v5 }
  0x91   :  { %1035 = vmatpush.bf16.msrb.mxu1 %v1748_v30  ;;  %v1763_v30 = vld [vmem:[#allocation10 + $0x8] sm:$0xff] }
  0x94   :  { %1049 = vmatpush.bf16.msrb.mxu3 %v1755_v38  ;;  %1130 = vmatpush.bf16.msrb.mxu0 %v1764_v51 }
  0x95   :  { %1036 = vmatpush.bf16.msrb.mxu1 %v1747_v6 }
  0x98   :  { %1050 = vmatpush.bf16.msrb.mxu3 %v1754_v40  ;;  %1131 = vmatpush.bf16.msrb.mxu0 %v1763_v30 }
  0x99   :  { %1037 = vmatpush.bf16.msrb.mxu1 %v1746_v7  ;;  %v1762_v7 = vld [vmem:[#allocation10] sm:$0xff] }
  0x9c   :  { %1132 = vmatpush.bf16.msrb.mxu0 %v1762_v7 }
  0xb6   :  { %v723_v0 = vpop.f32.mrf.mxu0 }
  0xb7   :  { %v724_v13 = vadd.f32 %v723_v0, %v216_v11  ;;  %v1781_v11 = vld [vmem:[%s2044_s6] ss:$0 sm:$0xff] }
  0xb9   :  { %v736_v37 = vpop.f32.mrf.mxu1 }
  0xba   :  { %v737_v15 = vadd.f32 %v736_v37, %v724_v13  ;;  %v1780_v37 = vld [vmem:[%s2042_s4] ss:$0 sm:$0xff] }
  0xbd   :  { %v749_v8 = vpop.f32.mrf.mxu2 }
  0xbe   :  { %v762_v1 = vpop.f32.mrf.mxu3  ;;  %v725_v9 = vpop.f32.mrf.mxu0  ;;  %v750_v17 = vadd.f32 %v749_v8, %v737_v15 }
  0xc0   :  { %v763_v18 = vadd.f32 %v762_v1, %v750_v17 }
  0xc1   :  { %v738_v10 = vpop.f32.mrf.mxu1 }
  0xc5   :  { %v751_v56 = vpop.f32.mrf.mxu2 }
  0xc6   :  { %v764_v14 = vpop.f32.mrf.mxu3 }
  0xcd   :  { %v801_v16 = vpop.f32.mrf.mxu2 }
  0xd5   :  { %v803_v22 = vpop.f32.mrf.mxu2 }
  0xd6   :  { %v775_v20 = vpop.f32.mrf.mxu0 }
  0xd7   :  { %v776_v21 = vadd.f32 %v775_v20, %v763_v18 }
  0xd9   :  { %v788_v23 = vpop.f32.mrf.mxu1 }
  0xda   :  { %v789_v24 = vadd.f32 %v788_v23, %v776_v21 }
  0xdc   :  { %v802_v26 = vadd.f32 %v801_v16, %v789_v24 }
  0xde   :  { %v896_v27 = vpack.c.bf16 %v802_v26, %v802_v26  ;;  %v777_v29 = vpop.f32.mrf.mxu0  ;;  %v814_v33 = vpop.f32.mrf.mxu3 }
  0xdf   :  { %v815_v47 = vadd.f32 %v814_v33, %v217_v44 }
  0xe0   :  { %1038 = vmatmul.bf16.vlgmr.msrb.gmra.mxu1 %v896_v27 }
  0xe1   :  { %v827_v31 = vpop.f32.mrf.mxu2  ;;  %v790_v34 = vpop.f32.mrf.mxu1 }
  0xe2   :  { %v828_v50 = vadd.f32 %v827_v31, %v815_v47 }
  0xe6   :  { %v816_v39 = vpop.f32.mrf.mxu3 }
  0xe9   :  { %v829_v36 = vpop.f32.mrf.mxu2 }
  0xf6   :  { %v840_v41 = vpop.f32.mrf.mxu0 }
  0xf7   :  { %v841_v52 = vadd.f32 %v840_v41, %v828_v50 }
  0xf9   :  { %v853_v42 = vpop.f32.mrf.mxu1 }
  0xfa   :  { %v854_v55 = vadd.f32 %v853_v42, %v841_v52 }
  0xfe   :  { %v866_v45 = vpop.f32.mrf.mxu3  ;;  %v842_v46 = vpop.f32.mrf.mxu0 }
  0xff   :  { %v867_v57 = vadd.f32 %v866_v45, %v854_v55 }
 0x101   :  { %v879_v48 = vpop.f32.mrf.mxu2  ;;  %v855_v49 = vpop.f32.mrf.mxu1 }
 0x102   :  { %v880_v58 = vadd.f32 %v879_v48, %v867_v57 }
 0x106   :  { %v868_v53 = vpop.f32.mrf.mxu3 }
 0x109   :  { %v881_v54 = vpop.f32.mrf.mxu2 }
 0x111   :  { %v892_v59 = vpop.f32.mrf.mxu2 }
 0x112   :  { %v893_v60 = vadd.f32 %v892_v59, %v880_v58 }
 0x114   :  { %v897_v61 = vpack.c.bf16 %v893_v60, %v893_v60 }
 0x116   :  { %1051 = vmatmul.bf16.vlgmr.msrb.gmra.mxu3 %v897_v61 }
 0x119   :  { %v894_v62 = vpop.f32.mrf.mxu2 }
 0x15d   :  { %v1039_v6 = vpop.f32.mrf.mxu1 }
 0x15e   :  { %v1040_v8 = vadd.f32 %v1780_v37, %v1039_v6 }
 0x165   :  { %v1041_v0 = vpop.f32.mrf.mxu1 }
 0x199   :  { %v1052_v43 = vpop.f32.mrf.mxu3 }
 0x19a   :  { %v1053_v1 = vadd.f32 %v1052_v43, %v1040_v8 }
 0x19c   :  { %v1056_v9 = vpack.c.bf16 %v1053_v1, %v1053_v1 }
 0x19e   :  { %1133 = vmatmul.bf16.vlgmr.msrb.gmra.mxu0 %v1056_v9 }
 0x1a1   :  { %v1054_v10 = vpop.f32.mrf.mxu3 }
 0x21b   :  { %v1134_v56 = vpop.f32.mrf.mxu0 }
 0x21c   :  { %v1135_v12 = vadd.f32 %v1781_v11, %v1134_v56 }
 0x21e   :  { %1138 = vst [vmem:[#allocation11] sm:$0xff] %v1135_v12 }
 0x21f   :  { %1149 = dma.vmem_to_hbm [thread:$0]  %s1145_s30, 128, %s1147_s10, [#allocation4]  }
 0x223   :  { %v1136_v13 = vpop.f32.mrf.mxu0 }
 0x224   :  { %1932 = dma.done.wait [#allocation4], 128  }
 0x225   :  { %1933 = vsyncadd [#allocation4], 4294967168 }
 0x226   :  { %1154 = vsyncpa [#allocation3], 1 }
 0x227   :  { %1155 = vsyncpa [#allocation6], 1 }
 0x228   :  { %1156 = vsyncpa [#allocation9], 1 }
 0x229   :  { %1157 = vsyncpa [#allocation4], 1 }

</bundles_post_ra>
